<compile_context>
chip_gen: v6e
topology: v6e:2x2x1
jax: 0.10.0
libtpu: 0.0.40
codegen_flags: <defaults>
</compile_context>

<pallas_src>
import functools

import jax
import jax.numpy as jnp
from jax import lax
from jax.experimental import pallas as pl
from jax.experimental.pallas import tpu as pltpu

EPS = 1e-5                          # nn.BatchNorm1d default eps
SINGLE_PASS_VMEM_BUDGET = 24 << 20  # double-buffered in+out blocks for the resident path
VMEM_LIMIT_BYTES = 32 << 20         # explicit scoped-VMEM request (safe on v5e/v6e/v7x)
ROW_TILE_TARGET_BYTES = 2 << 20     # ~2 MiB x-blocks: deep pipelining, amortized DMA overhead


def _round_up(x, m):
    return (x + m - 1) // m * m


def _pick_tc(C):
    """Lane-dense channel tile: multiple of 128 dividing C, capped at 512, >=2 steps if possible."""
    if C % 128 == 0:
        tc = 128
        for cand in (512, 256, 128):
            if C % cand == 0:
                tc = cand
                break
        # Prefer >=2 channel-tile steps so the 'parallel' axis can be sharded across TCs (v7x).
        while tc > 128 and C // tc < 2:
            tc //= 2
        return tc
    # TODO(synk): for C < 128, pack groups of rows into the lane dim to avoid masked stores.
    return C


def _pick_tr(rows, tc, itemsize):
    """Row tile: multiple of 8, ~ROW_TILE_TARGET_BYTES per x-block, capped at the row extent."""
    tr = max(8, ROW_TILE_TARGET_BYTES // (tc * itemsize))
    tr = (tr // 8) * 8
    return int(max(8, min(tr, _round_up(rows, 8))))


def _fused_kernel(x_ref, g_ref, b_ref, o_ref, *, eps, inv_n):
    # Single-pass path: the whole row extent of one channel tile is resident in VMEM.
    x = x_ref[...].astype(jnp.float32)                              # (rows, tc)
    s = jnp.sum(x, axis=0, keepdims=True)                           # sublane reduce (XLU)
    sq = jnp.sum(x * x, axis=0, keepdims=True)
    mean = s * inv_n
    var = jnp.maximum(sq * inv_n - mean * mean, 0.0)                # biased variance
    scale = g_ref[...].astype(jnp.float32) * lax.rsqrt(var + eps)   # EUP rsqrt
    shift = b_ref[...].astype(jnp.float32) - mean * scale
    o_ref[...] = (x * scale + shift).astype(o_ref.dtype)


def _stats_kernel(x_ref, g_ref, b_ref, scale_ref, shift_ref, *, eps, inv_n):
    # Pass 1: accumulate per-channel sum / sum-of-squares into the resident output blocks
    # across the trailing "arbitrary" row-tile axis; convert to scale/shift at the last step.
    k = pl.program_id(1)

    @pl.when(k == 0)
    def _():
        scale_ref[...] = jnp.zeros_like(scale_ref)   # running sum(x)
        shift_ref[...] = jnp.zeros_like(shift_ref)   # running sum(x*x)

    x = x_ref[...].astype(jnp.float32)               # (tr, tc)
    scale_ref[...] += jnp.sum(x, axis=0, keepdims=True)
    shift_ref[...] += jnp.sum(x * x, axis=0, keepdims=True)

    @pl.when(k == pl.num_programs(1) - 1)
    def _():
        mean = scale_ref[...] * inv_n
        var = jnp.maximum(shift_ref[...] * inv_n - mean * mean, 0.0)  # biased variance
        scale = g_ref[...].astype(jnp.float32) * lax.rsqrt(var + eps)
        scale_ref[...] = scale
        shift_ref[...] = b_ref[...].astype(jnp.float32) - mean * scale


def _normalize_kernel(x_ref, scale_ref, shift_ref, o_ref):
    # Pass 2: row-tiled elementwise normalize (fully parallel, memory-bound).
    x = x_ref[...].astype(jnp.float32)
    o_ref[...] = (x * scale_ref[...] + shift_ref[...]).astype(o_ref.dtype)


def batch_norm_fc1d(x, gamma, beta, *, eps=EPS, tc=None, tr=None, force_two_pass=False):
    """x: (N, L, C); gamma, beta: (C,). Training-mode BatchNorm1d over the (N*L, C) view."""
    # TODO(synk): running_mean / running_var buffer updates (nn.BatchNorm1d training side
    # effect) are not produced; only the forward normalization is implemented.
    N, L, C = x.shape
    rows = N * L
    x2 = x.reshape(rows, C)
    gamma2 = gamma.reshape(1, C).astype(jnp.float32)
    beta2 = beta.reshape(1, C).astype(jnp.float32)

    if tc is None:
        tc = _pick_tc(C)
    assert tc == C or (C % tc == 0 and tc % 128 == 0), (
        "channel tile must be the full C or a multiple of 128 that divides C")

    xb = x.dtype.itemsize
    inv_n = 1.0 / rows

    # ---------------- single-pass resident path (small rows*C only) ----------------
    # Footprint of the double-buffered x + out blocks for one channel tile.
    fused_bytes = 2 * rows * tc * (xb + xb)
    if (not force_two_pass) and fused_bytes <= SINGLE_PASS_VMEM_BUDGET:
        out = pl.pallas_call(
            functools.partial(_fused_kernel, eps=eps, inv_n=inv_n),
            out_shape=jax.ShapeDtypeStruct((rows, C), x.dtype),
            grid_spec=pltpu.PrefetchScalarGridSpec(
                num_scalar_prefetch=0,
                grid=(C // tc,),
                in_specs=[
                    pl.BlockSpec((rows, tc), lambda j: (0, j)),   # x: all rows, one channel tile
                    pl.BlockSpec((1, tc), lambda j: (0, j)),      # gamma
                    pl.BlockSpec((1, tc), lambda j: (0, j)),      # beta
                ],
                out_specs=pl.BlockSpec((rows, tc), lambda j: (0, j)),
            ),
            compiler_params=pltpu.CompilerParams(
                dimension_semantics=("parallel",),
                vmem_limit_bytes=VMEM_LIMIT_BYTES),
            cost_estimate=pl.CostEstimate(
                flops=5 * rows * C, transcendentals=C,
                bytes_accessed=2 * rows * C * xb),
        )(x2, gamma2, beta2)
        return out.reshape(N, L, C)

    # ---------------- two-pass row-tiled path (production shapes) ----------------
    if tr is None:
        tr = _pick_tr(rows, tc, xb)
    tr = int(max(8, (tr // 8) * 8))
    padded_rows = _round_up(rows, tr)
    if padded_rows != rows:
        # Zero rows contribute 0 to both sum and sum-of-squares, so the stats stay exact
        # as long as inv_n uses the true row count.
        # TODO(synk): mask the tail row tile in-kernel instead of paying an HBM pad copy.
        x2 = jnp.pad(x2, ((0, padded_rows - rows), (0, 0)))
    R = padded_rows // tr

    # Pass 1: per-channel scale/shift (reduction over row tiles, channel tiles parallel).
    scale, shift = pl.pallas_call(
        functools.partial(_stats_kernel, eps=eps, inv_n=inv_n),
        out_shape=(jax.ShapeDtypeStruct((1, C), jnp.float32),
                   jax.ShapeDtypeStruct((1, C), jnp.float32)),
        grid_spec=pltpu.PrefetchScalarGridSpec(
            num_scalar_prefetch=0,
            grid=(C // tc, R),
            in_specs=[
                pl.BlockSpec((tr, tc), lambda j, k: (k, j)),   # x row/channel tile
                pl.BlockSpec((1, tc), lambda j, k: (0, j)),    # gamma
                pl.BlockSpec((1, tc), lambda j, k: (0, j)),    # beta
            ],
            out_specs=[
                pl.BlockSpec((1, tc), lambda j, k: (0, j)),    # scale (resident over k)
                pl.BlockSpec((1, tc), lambda j, k: (0, j)),    # shift (resident over k)
            ],
        ),
        compiler_params=pltpu.CompilerParams(
            dimension_semantics=("parallel", "arbitrary"),
            vmem_limit_bytes=VMEM_LIMIT_BYTES),
        cost_estimate=pl.CostEstimate(
            flops=3 * padded_rows * C, transcendentals=C,
            bytes_accessed=padded_rows * C * xb + 4 * C * 4),
    )(x2, gamma2, beta2)

    # Pass 2: normalize (fully parallel, memory-bound).
    out = pl.pallas_call(
        _normalize_kernel,
        out_shape=jax.ShapeDtypeStruct((padded_rows, C), x.dtype),
        grid_spec=pltpu.PrefetchScalarGridSpec(
            num_scalar_prefetch=0,
            grid=(R, C // tc),
            in_specs=[
                pl.BlockSpec((tr, tc), lambda i, j: (i, j)),   # x
                pl.BlockSpec((1, tc), lambda i, j: (0, j)),    # scale
                pl.BlockSpec((1, tc), lambda i, j: (0, j)),    # shift
            ],
            out_specs=pl.BlockSpec((tr, tc), lambda i, j: (i, j)),
        ),
        compiler_params=pltpu.CompilerParams(
            dimension_semantics=("parallel", "parallel"),
            vmem_limit_bytes=VMEM_LIMIT_BYTES),
        cost_estimate=pl.CostEstimate(
            flops=2 * padded_rows * C, transcendentals=0,
            bytes_accessed=2 * padded_rows * C * xb + 2 * C * 4),
    )(x2, scale, shift)

    return out[:rows].reshape(N, L, C)


def reference(x, gamma, beta, eps=EPS):
    N, L, C = x.shape
    x2 = x.reshape(N * L, C).astype(jnp.float32)
    mean = jnp.mean(x2, axis=0, keepdims=True)
    var = jnp.mean((x2 - mean) ** 2, axis=0, keepdims=True)  # biased, like BN training fwd
    out = (x2 - mean) / jnp.sqrt(var + eps) * gamma[None, :] + beta[None, :]
    return out.reshape(N, L, C).astype(x.dtype)


if __name__ == "__main__":
    key = jax.random.PRNGKey(0)
    key_a, key_b = jax.random.split(key)

    # Small shape matching the module's forward: x (N, L, C) with BatchNorm1d(C).
    N, L, C = 2, 8, 32
    x = jax.random.normal(key_a, (N, L, C), jnp.float32)
    gamma = jnp.ones((C,), jnp.float32)   # nn.init.constant_(self.norm.weight, 1)
    beta = jnp.zeros((C,), jnp.float32)   # nn.init.constant_(self.norm.bias, 0)
    ref = reference(x, gamma, beta)

    # Single-pass resident path (fits the explicit VMEM budget at this size).
    out1 = jax.block_until_ready(batch_norm_fc1d(x, gamma, beta))
    assert out1.shape == (N, L, C)
    assert jnp.allclose(out1, ref, atol=1e-4, rtol=1e-4), "single-pass mismatch vs reference"

    # Two-pass row-tiled path on the same input (what production shapes use).
    out2 = jax.block_until_ready(batch_norm_fc1d(x, gamma, beta, force_two_pass=True))
    assert jnp.allclose(out2, ref, atol=1e-4, rtol=1e-4), "two-pass mismatch vs reference"

    # Two-pass path with lane-dense channel tiles, multiple row steps and tail padding.
    N2, L2, C2 = 3, 40, 256
    x_big = jax.random.normal(key_b, (N2, L2, C2), jnp.float32)
    g_big = jnp.ones((C2,), jnp.float32)
    b_big = jnp.zeros((C2,), jnp.float32)
    out3 = jax.block_until_ready(
        batch_norm_fc1d(x_big, g_big, b_big, tr=64, force_two_pass=True))
    assert jnp.allclose(out3, reference(x_big, g_big, b_big), atol=1e-4, rtol=1e-4), (
        "two-pass (tiled) mismatch vs reference")

    print("KERNEL_OK")
</pallas_src>

<mosaic_0001>
module attributes {stable_mosaic.version = 11 : i64} {
  func.func @_fused_kernel(%arg0: i32, %arg1: memref<16x32xf32, #tpu.memory_space<vmem>>, %arg2: memref<1x32xf32, #tpu.memory_space<vmem>>, %arg3: memref<1x32xf32, #tpu.memory_space<vmem>>, %arg4: memref<16x32xf32, #tpu.memory_space<vmem>>) attributes {dimension_semantics = [#tpu.dimension_semantics<parallel>], iteration_bounds = array<i64: 1>, scalar_prefetch = 0 : i64, scratch_operands = 0 : i64, tpu.core_type = #tpu.core_type<tc>, window_params = [{transform_indices = @transform_0, window_bounds = array<i64: 16, 32>}, {transform_indices = @transform_1, window_bounds = array<i64: 1, 32>}, {transform_indices = @transform_2, window_bounds = array<i64: 1, 32>}, {transform_indices = @transform_3, window_bounds = array<i64: 16, 32>}]} {
    %c0 = arith.constant 0 : index
    %c0_0 = arith.constant 0 : index
    %0 = vector.load %arg1[%c0, %c0_0] : memref<16x32xf32, #tpu.memory_space<vmem>>, vector<16x32xf32>
    %cst = arith.constant dense<0.000000e+00> : vector<32xf32>
    %1 = vector.multi_reduction <add>, %0, %cst [0] : vector<16x32xf32> to vector<32xf32>
    %2 = vector.shape_cast %1 : vector<32xf32> to vector<1x32xf32>
    %3 = arith.mulf %0, %0 : vector<16x32xf32>
    %cst_1 = arith.constant dense<0.000000e+00> : vector<32xf32>
    %4 = vector.multi_reduction <add>, %3, %cst_1 [0] : vector<16x32xf32> to vector<32xf32>
    %5 = vector.shape_cast %4 : vector<32xf32> to vector<1x32xf32>
    %cst_2 = arith.constant 6.250000e-02 : f32
    %6 = vector.broadcast %cst_2 : f32 to vector<1x32xf32>
    %7 = arith.mulf %2, %6 : vector<1x32xf32>
    %cst_3 = arith.constant 6.250000e-02 : f32
    %8 = vector.broadcast %cst_3 : f32 to vector<1x32xf32>
    %9 = arith.mulf %5, %8 : vector<1x32xf32>
    %10 = arith.mulf %7, %7 : vector<1x32xf32>
    %11 = arith.subf %9, %10 : vector<1x32xf32>
    %cst_4 = arith.constant 0.000000e+00 : f32
    %12 = vector.broadcast %cst_4 : f32 to vector<1x32xf32>
    %13 = arith.maximumf %11, %12 : vector<1x32xf32>
    %c0_5 = arith.constant 0 : index
    %c0_6 = arith.constant 0 : index
    %14 = vector.load %arg2[%c0_5, %c0_6] : memref<1x32xf32, #tpu.memory_space<vmem>>, vector<1x32xf32>
    %cst_7 = arith.constant 9.99999974E-6 : f32
    %15 = vector.broadcast %cst_7 : f32 to vector<1x32xf32>
    %16 = arith.addf %13, %15 : vector<1x32xf32>
    %17 = math.rsqrt %16 : vector<1x32xf32>
    %18 = arith.mulf %14, %17 : vector<1x32xf32>
    %c0_8 = arith.constant 0 : index
    %c0_9 = arith.constant 0 : index
    %19 = vector.load %arg3[%c0_8, %c0_9] : memref<1x32xf32, #tpu.memory_space<vmem>>, vector<1x32xf32>
    %20 = arith.mulf %7, %18 : vector<1x32xf32>
    %21 = arith.subf %19, %20 : vector<1x32xf32>
    %22 = vector.broadcast %18 : vector<1x32xf32> to vector<16x32xf32>
    %23 = arith.mulf %0, %22 : vector<16x32xf32>
    %24 = vector.broadcast %21 : vector<1x32xf32> to vector<16x32xf32>
    %25 = arith.addf %23, %24 : vector<16x32xf32>
    %c0_10 = arith.constant 0 : index
    %c0_11 = arith.constant 0 : index
    %26 = vector.load %arg4[%c0_10, %c0_11] : memref<16x32xf32, #tpu.memory_space<vmem>>, vector<16x32xf32>
    tpu.vector_store %arg4[%c0_10, %c0_11], %25 {strides = array<i32>} : memref<16x32xf32, #tpu.memory_space<vmem>>, vector<16x32xf32>,
    return
  }
  func.func @transform_0(%arg0: i32) -> (i32, i32) {
    %c0_i32 = arith.constant 0 : i32
    %c0_i32_0 = arith.constant 0 : i32
    return %c0_i32, %arg0 : i32, i32
  }
  func.func @transform_1(%arg0: i32) -> (i32, i32) {
    %c0_i32 = arith.constant 0 : i32
    %c0_i32_0 = arith.constant 0 : i32
    return %c0_i32, %arg0 : i32, i32
  }
  func.func @transform_2(%arg0: i32) -> (i32, i32) {
    %c0_i32 = arith.constant 0 : i32
    %c0_i32_0 = arith.constant 0 : i32
    return %c0_i32, %arg0 : i32, i32
  }
  func.func @transform_3(%arg0: i32) -> (i32, i32) {
    %c0_i32 = arith.constant 0 : i32
    %c0_i32_0 = arith.constant 0 : i32
    return %c0_i32, %arg0 : i32, i32
  }
}

</mosaic_0001>

<bundles_post_ra>
// kernel: tpu_custom_call.1
= control target key start
LH: loop header
LB: loop body
LE: loop exit
PB: predicated region body
PF: predicated region fallthrough
CT: control target
= control target key end

     0   :  { %8 = vsyncpa [#allocation3], 0  ;;  %s197_s0 = inlined_call_operand.hbm [shape: f32[16,32], index: 0, kind: input, shape index: {}]   ;;  %s198_s1 = inlined_call_operand.vmem [shape: f32[1,32], index: 1, kind: input, shape index: {}]   ;;  %s199_s2 = inlined_call_operand.vmem [shape: f32[1,32], index: 2, kind: input, shape index: {}]   ;;  %s200_s3 = inlined_call_operand.hbm [shape: f32[16,32], index: 3, kind: output, shape index: {}]  }
   0x1   :  { %9 = vsyncpa [#allocation4], 0  ;;  %s149_s12 = smov [#allocation2]  }
   0x2   :  { %s15_s13 = sshll.u32 %s149_s12, 4  ;;  %s16_s13 = int_to_ptr.vmem [resolvable:$true] %s15_s13 }
   0x3   :  { %s113_s14 = scalar_lea.vmem %s16_s13, 256  ;;  %p118_p1 = scmp.lt.s32.totalorder %s16_s13, %s16_s13 }
   0x4   :  { %p114_p0 = scmp.ne.s32.totalorder %s16_s13, %s113_s14  ;;  %p119_p2 = scmp.lt.s32.totalorder %s113_s14, %s113_s14 }
   0x6   :  { %p120_p3 = por %p119_p2, %p118_p1 }
   0x8   :  { %p121_p4 = pnand %p120_p3, %p114_p0 }
   0xa   :  { %124 = shalt.err (!%p121_p4)
}
   0xb   :  { %s150_s15 = smov 128   ;;  %s151_s16 = smov 8  }
   0xc   :  { %21 = dma.hbm_to_vmem [thread:$0]  %s197_s0, 256, %s16_s13, [#allocation3], %s150_s15, %s150_s15, %s151_s16  }
   0xd   :  { %145 = dma.done.wait [#allocation3], 256  }
   0xe   :  { %146 = vsyncadd [#allocation3], 4294967040  ;;  %vm31_vm0 = vcmask 261120   ;;  %v29_v0 = vld [vmem:[#allocation2] sm:$0xff]  ;;  %v30_v1 = vld [vmem:[#allocation2 + $0x8] sm:$0xff]  ;;  %v65_v28 = vlaneseq  ;;  %s152_s22 = smov [#allocation5]  }
   0xf   :  { %v32_v2 = vsel %vm31_vm0, %v29_v0, 0.0  ;;  %v33_v3 = vsel %vm31_vm0, %v30_v1, 0.0  ;;  %v41_v4 = vmul.f32 %v29_v0, %v29_v0  ;;  %v42_v5 = vmul.f32 %v30_v1, %v30_v1  ;;  %v57_v30 = vld [vmem:[%s198_s1] sm:$0x1]  ;;  %s87_s23 = sshll.u32 %s152_s22, 4  ;;  %s88_s23 = int_to_ptr.vmem [resolvable:$true] %s87_s23 }
  0x10   :  { %v34_v6 = vadd.f32 %v33_v3, %v32_v2  ;;  %v66_v29 = vshrl.u32 %v65_v28, 7  ;;  %v61_v34 = vld [vmem:[%s199_s2] sm:$0x1]  ;;  %s125_s1 = scalar_lea.vmem %s88_s23, 256  ;;  %p130_p6 = scmp.lt.s32.totalorder %s88_s23, %s88_s23 }
  0x11   :  { %v43_v7 = vsel %vm31_vm0, %v41_v4, 0.0  ;;  %v44_v8 = vsel %vm31_vm0, %v42_v5, 0.0  ;;  %p126_p5 = scmp.ne.s32.totalorder %s88_s23, %s125_s1  ;;  %p131_p7 = scmp.lt.s32.totalorder %s125_s1, %s125_s1 }
  0x12   :  { %v35_v9 = vrot.slane %v34_v6, 4  ;;  %v45_v10 = vadd.f32 %v44_v8, %v43_v7  ;;  %v67_v31 = vsub.s32 0, %v66_v29 }
  0x13   :  { %p132_p8 = por %p131_p7, %p130_p6 }
  0x14   :  { %v36_v11 = vadd.f32 %v35_v9, %v34_v6  ;;  %v46_v12 = vrot.slane %v45_v10, 4 }
  0x15   :  { %p133_p9 = pnand %p132_p8, %p126_p5 }
  0x16   :  { %v37_v13 = vrot.slane %v36_v11, 2  ;;  %v47_v14 = vadd.f32 %v46_v12, %v45_v10 }
  0x18   :  { %v38_v15 = vadd.f32 %v37_v13, %v36_v11  ;;  %v48_v16 = vrot.slane %v47_v14, 2 }
  0x1a   :  { %v39_v17 = vrot.slane %v38_v15, 1  ;;  %v49_v18 = vadd.f32 %v48_v16, %v47_v14 }
  0x1c   :  { %v40_v19 = vadd.f32 %v39_v17, %v38_v15  ;;  %v50_v20 = vrot.slane %v49_v18, 1 }
  0x1e   :  { %v51_v21 = vadd.f32 %v50_v20, %v49_v18  ;;  %v52_v22 = vmul.f32 0.0625, %v40_v19 }
  0x20   :  { %v53_v23 = vmul.f32 0.0625, %v51_v21  ;;  %v54_v24 = vmul.f32 %v52_v22, %v52_v22 }
  0x22   :  { %v55_v25 = vsub.f32 %v53_v23, %v54_v24 }
  0x24   :  { %v56_v26 = vmax.f32 %v55_v25, 0.0 }
  0x26   :  { %v58_v27 = vadd.f32 1e-05, %v56_v26 }
  0x28   :  { %103 = vrsqrt.f32 %v58_v27 }
  0x35   :  { %v104_v32 = vpop.eup %103 }
  0x36   :  { %v60_v33 = vmul.f32 %v104_v32, %v57_v30 }
  0x38   :  { %v62_v35 = vmul.f32 %v60_v33, %v52_v22  ;;  %v68_v36 = vrot.slane %v60_v33, %v67_v31 }
  0x3a   :  { %v63_v37 = vsub.f32 %v61_v34, %v62_v35  ;;  %v70_v38 = vmul.f32 %v68_v36, %v29_v0  ;;  %v71_v39 = vmul.f32 %v68_v36, %v30_v1 }
  0x3c   :  { %v76_v40 = vrot.slane %v63_v37, %v67_v31 }
  0x3e   :  { %v78_v41 = vadd.f32 %v76_v40, %v70_v38  ;;  %v79_v42 = vadd.f32 %v76_v40, %v71_v39 }
  0x40   :  { %80 = vst.msk [vmem:[#allocation5] sm:$0xff] %vm31_vm0, %v78_v41  ;;  %81 = vst.msk [vmem:[#allocation5 + $0x8] sm:$0xff] %vm31_vm0, %v79_v42 }
  0x41   :  { %136 = shalt.err (!%p133_p9)
}
  0x42   :  { %93 = dma.vmem_to_hbm [thread:$0]  %s88_s23, 256, %s200_s3, [#allocation4], %s150_s15, %s150_s15, %s151_s16  }
  0x43   :  { %147 = dma.done.wait [#allocation4], 256  }
  0x44   :  { %148 = vsyncadd [#allocation4], 4294967040 }
  0x45   :  { %97 = vsyncpa [#allocation3], 1 }
  0x46   :  { %98 = vsyncpa [#allocation4], 1 }

</bundles_post_ra>
